<compile_context>
chip_gen: v5e
topology: v5e:2x2
jax: 0.10.0
libtpu: 0.0.40
codegen_flags: <defaults>
</compile_context>

<pallas_src>
import jax
import jax.numpy as jnp
from jax.experimental import pallas as pl
from jax.experimental.pallas import tpu as pltpu


def _round_up(x, m):
    return (x + m - 1) // m * m


def _linear_kernel(x_ref, w_ref, b_ref, o_ref, acc_ref):
    # x_ref: (tm, tk) bf16   w_ref: (tk, tn) bf16   b_ref: (1, tn) f32
    # o_ref: (tm, tn) out dtype   acc_ref: (tm, tn) f32 scratch
    k = pl.program_id(2)

    @pl.when(k == 0)
    def _():
        acc_ref[...] = jnp.zeros_like(acc_ref)

    acc_ref[...] += jnp.dot(x_ref[...], w_ref[...],
                            preferred_element_type=jnp.float32)

    @pl.when(k == pl.num_programs(2) - 1)
    def _():
        o_ref[...] = (acc_ref[...] + b_ref[...]).astype(o_ref.dtype)


def pallas_linear(x, w_t, b, *, tm=256, tn=256, tk=512):
    """y = x @ w_t + b  implemented with a tiled, K-pipelined Pallas TPU kernel.

    x   : [M, K]  float32 activations
    w_t : [K, N]  float32 (nn.Linear weight, stored transposed)
    b   : [N]     float32
    """
    M, K = x.shape
    K2, N = w_t.shape
    assert K == K2
    out_dtype = x.dtype

    # Clamp tile sizes for small problems while keeping (8, 128) alignment.
    tm = min(tm, _round_up(M, 8))
    tn = min(tn, _round_up(N, 128))
    tk = min(tk, _round_up(K, 128))

    Mp, Np, Kp = _round_up(M, tm), _round_up(N, tn), _round_up(K, tk)

    # Feed the MXU bf16 (native on v6e/v7x); accumulate in f32. Zero-pad to
    # full tiles so the grid needs no edge masking; padding rows/cols are
    # sliced off at the end.
    xp = jnp.zeros((Mp, Kp), jnp.bfloat16).at[:M, :K].set(x.astype(jnp.bfloat16))
    wp = jnp.zeros((Kp, Np), jnp.bfloat16).at[:K, :N].set(w_t.astype(jnp.bfloat16))
    bp = jnp.zeros((1, Np), jnp.float32).at[0, :N].set(b.astype(jnp.float32))

    grid = (Mp // tm, Np // tn, Kp // tk)

    out_bytes = jnp.dtype(out_dtype).itemsize
    cost = pl.CostEstimate(
        flops=2 * Mp * Np * Kp,
        transcendentals=0,
        bytes_accessed=Mp * Kp * 2 + Kp * Np * 2 + Mp * Np * out_bytes + Np * 4,
    )

    out = pl.pallas_call(
        _linear_kernel,
        out_shape=jax.ShapeDtypeStruct((Mp, Np), out_dtype),
        grid_spec=pltpu.PrefetchScalarGridSpec(
            num_scalar_prefetch=0,
            grid=grid,
            in_specs=[
                pl.BlockSpec((tm, tk), lambda i, j, k: (i, k)),  # activation tile
                pl.BlockSpec((tk, tn), lambda i, j, k: (k, j)),  # weight tile
                pl.BlockSpec((1, tn), lambda i, j, k: (0, j)),   # bias tile
            ],
            out_specs=pl.BlockSpec((tm, tn), lambda i, j, k: (i, j)),
            scratch_shapes=[pltpu.VMEM((tm, tn), jnp.float32)],
        ),
        compiler_params=pltpu.CompilerParams(
            dimension_semantics=("parallel", "parallel", "arbitrary"),
            vmem_limit_bytes=48 * 1024 * 1024,  # safe on v7x (64 MiB physical)
        ),
        cost_estimate=cost,
    )(xp, wp, bp)

    return out[:M, :N]


class LinearPallas:
    """JAX/Pallas port of the PyTorch `Linear` module (classify head)."""

    def __init__(self, in_features, out_features, network_name="net", group_rank=1,
                 key=jax.random.PRNGKey(0)):
        self.network_name = network_name
        self.group_rank = group_rank
        kw, kb = jax.random.split(key)
        # init matching nn.Linear's U(-1/sqrt(in), 1/sqrt(in))
        bound = 1.0 / (in_features ** 0.5)
        # weight stored already transposed: [in_features, out_features]
        self.w_t = jax.random.uniform(kw, (in_features, out_features),
                                      jnp.float32, -bound, bound)
        self.b = jax.random.uniform(kb, (out_features,), jnp.float32, -bound, bound)

    def __call__(self, features, aggregate_mode="none"):
        if aggregate_mode == "average":
            # TODO(synk): logits2Grouplogits is external/undefined in the source module.
            pass
        elif aggregate_mode == "convolution":
            # TODO(synk): AggregateLogitsWithConvolution is external/undefined in the source module.
            pass
        return pallas_linear(features, self.w_t, self.b)


if __name__ == "__main__":
    key = jax.random.PRNGKey(0)
    k_x, k_p = jax.random.split(key)

    # Small, deliberately non-tile-aligned shapes to exercise the padding path.
    batch = 24
    in_features = 160
    out_features = 48

    x = jax.random.normal(k_x, (batch, in_features), jnp.float32)

    model = LinearPallas(in_features, out_features, "toy_net", group_rank=1, key=k_p)
    y = model(x, aggregate_mode="none")
    y = jax.block_until_ready(y)

    # Reference: same bf16-input / f32-accumulate math in plain JAX.
    xb = x.astype(jnp.bfloat16).astype(jnp.float32)
    wb = model.w_t.astype(jnp.bfloat16).astype(jnp.float32)
    y_ref = xb @ wb + model.b

    assert y.shape == (batch, out_features)
    assert jnp.allclose(y, y_ref, atol=1e-2, rtol=1e-2)

    print("KERNEL_OK")
</pallas_src>

<mosaic_0001>
module attributes {stable_mosaic.version = 11 : i64} {
  func.func @_linear_kernel(%arg0: i32, %arg1: i32, %arg2: i32, %arg3: memref<24x256xbf16, #tpu.memory_space<vmem>>, %arg4: memref<256x128xbf16, #tpu.memory_space<vmem>>, %arg5: memref<1x128xf32, #tpu.memory_space<vmem>>, %arg6: memref<24x128xf32, #tpu.memory_space<vmem>>, %arg7: memref<24x128xf32, #tpu.memory_space<vmem>>) attributes {dimension_semantics = [#tpu.dimension_semantics<parallel>, #tpu.dimension_semantics<parallel>, #tpu.dimension_semantics<arbitrary>], iteration_bounds = array<i64: 1, 1, 1>, scalar_prefetch = 0 : i64, scratch_operands = 1 : i64, tpu.core_type = #tpu.core_type<tc>, window_params = [{transform_indices = @transform_0, window_bounds = array<i64: 24, 256>}, {transform_indices = @transform_1, window_bounds = array<i64: 256, 128>}, {transform_indices = @transform_2, window_bounds = array<i64: 1, 128>}, {transform_indices = @transform_3, window_bounds = array<i64: 24, 128>}]} {
    %c0_i32 = arith.constant 0 : i32
    %0 = arith.cmpi eq, %arg2, %c0_i32 : i32
    %1 = arith.extui %0 : i1 to i32
    %c0_i32_0 = arith.constant 0 : i32
    %2 = arith.cmpi ne, %1, %c0_i32_0 : i32
    scf.if %2 {
      %cst_10 = arith.constant 0.000000e+00 : f32
      %12 = vector.broadcast %cst_10 : f32 to vector<24x128xf32>
      %c0_11 = arith.constant 0 : index
      %c0_12 = arith.constant 0 : index
      %13 = vector.load %arg7[%c0_11, %c0_12] : memref<24x128xf32, #tpu.memory_space<vmem>>, vector<24x128xf32>
      tpu.vector_store %arg7[%c0_11, %c0_12], %12 {strides = array<i32>} : memref<24x128xf32, #tpu.memory_space<vmem>>, vector<24x128xf32>,
    } else {
    }
    %c0 = arith.constant 0 : index
    %c0_1 = arith.constant 0 : index
    %3 = vector.load %arg7[%c0, %c0_1] : memref<24x128xf32, #tpu.memory_space<vmem>>, vector<24x128xf32>
    %c0_2 = arith.constant 0 : index
    %c0_3 = arith.constant 0 : index
    %4 = vector.load %arg3[%c0_2, %c0_3] : memref<24x256xbf16, #tpu.memory_space<vmem>>, vector<24x256xbf16>
    %c0_4 = arith.constant 0 : index
    %c0_5 = arith.constant 0 : index
    %5 = vector.load %arg4[%c0_4, %c0_5] : memref<256x128xbf16, #tpu.memory_space<vmem>>, vector<256x128xbf16>
    %cst = arith.constant dense<0.000000e+00> : vector<24x128xf32>
    %6 = tpu.matmul %4, %5, %cst {dimension_numbers = #tpu.dot_dimension_numbers<[1], [0], [0], [1], [0, 0, 1, 1], [], []>} : vector<24x256xbf16>, vector<256x128xbf16>, vector<24x128xf32> -> vector<24x128xf32>
    %7 = arith.addf %3, %6 : vector<24x128xf32>
    %c0_6 = arith.constant 0 : index
    %c0_7 = arith.constant 0 : index
    %8 = vector.load %arg7[%c0_6, %c0_7] : memref<24x128xf32, #tpu.memory_space<vmem>>, vector<24x128xf32>
    tpu.vector_store %arg7[%c0_6, %c0_7], %7 {strides = array<i32>} : memref<24x128xf32, #tpu.memory_space<vmem>>, vector<24x128xf32>,
    %c0_i32_8 = arith.constant 0 : i32
    %9 = arith.cmpi eq, %arg2, %c0_i32_8 : i32
    %10 = arith.extui %9 : i1 to i32
    %c0_i32_9 = arith.constant 0 : i32
    %11 = arith.cmpi ne, %10, %c0_i32_9 : i32
    scf.if %11 {
      %c0_10 = arith.constant 0 : index
      %c0_11 = arith.constant 0 : index
      %12 = vector.load %arg7[%c0_10, %c0_11] : memref<24x128xf32, #tpu.memory_space<vmem>>, vector<24x128xf32>
      %c0_12 = arith.constant 0 : index
      %c0_13 = arith.constant 0 : index
      %13 = vector.load %arg5[%c0_12, %c0_13] : memref<1x128xf32, #tpu.memory_space<vmem>>, vector<1x128xf32>
      %14 = vector.broadcast %13 : vector<1x128xf32> to vector<24x128xf32>
      %15 = arith.addf %12, %14 : vector<24x128xf32>
      %c0_14 = arith.constant 0 : index
      %c0_15 = arith.constant 0 : index
      %16 = vector.load %arg6[%c0_14, %c0_15] : memref<24x128xf32, #tpu.memory_space<vmem>>, vector<24x128xf32>
      tpu.vector_store %arg6[%c0_14, %c0_15], %15 {strides = array<i32>} : memref<24x128xf32, #tpu.memory_space<vmem>>, vector<24x128xf32>,
    } else {
    }
    return
  }
  func.func @transform_0(%arg0: i32, %arg1: i32, %arg2: i32) -> (i32, i32) {
    %c0_i32 = arith.constant 0 : i32
    return %arg0, %arg2 : i32, i32
  }
  func.func @transform_1(%arg0: i32, %arg1: i32, %arg2: i32) -> (i32, i32) {
    %c0_i32 = arith.constant 0 : i32
    return %arg2, %arg1 : i32, i32
  }
  func.func @transform_2(%arg0: i32, %arg1: i32, %arg2: i32) -> (i32, i32) {
    %c0_i32 = arith.constant 0 : i32
    %c0_i32_0 = arith.constant 0 : i32
    return %c0_i32, %arg1 : i32, i32
  }
  func.func @transform_3(%arg0: i32, %arg1: i32, %arg2: i32) -> (i32, i32) {
    %c0_i32 = arith.constant 0 : i32
    return %arg0, %arg1 : i32, i32
  }
}

</mosaic_0001>

<bundles_post_ra>
// kernel: tpu_custom_call.1
= control target key start
LH: loop header
LB: loop body
LE: loop exit
PB: predicated region body
PF: predicated region fallthrough
CT: control target
= control target key end

     0   :  { %8 = vsyncpa [#allocation4], 0  ;;  %s520_s0 = inlined_call_operand.hbm [shape: bf16[24,256], index: 0, kind: input, shape index: {}]   ;;  %s521_s1 = inlined_call_operand.hbm [shape: bf16[256,128], index: 1, kind: input, shape index: {}]   ;;  %s522_s2 = inlined_call_operand.vmem [shape: f32[1,128], index: 2, kind: input, shape index: {}]   ;;  %s523_s3 = inlined_call_operand.hbm [shape: f32[24,128], index: 3, kind: output, shape index: {}]  }
   0x1   :  { %9 = vsyncpa [#allocation7], 0 }
   0x2   :  { %10 = vsyncpa [#allocation5], 0  ;;  %s15_s14 = sshll.u32 %s520_s0, 4  ;;  %s475_s15 = smov [#allocation3]   ;;  %s16_s14 = int_to_ptr.hbm [resolvable:$true] %s15_s14 }
   0x3   :  { %s17_s16 = sshll.u32 %s475_s15, 4  ;;  %s28_s19 = sshll.u32 %s521_s1, 4  ;;  %s18_s16 = int_to_ptr.vmem [resolvable:$true] %s17_s16  ;;  %s29_s19 = int_to_ptr.hbm [resolvable:$true] %s28_s19 }
   0x4   :  { %s476_s20 = smov 128   ;;  %s477_s21 = smov 8  }
   0x5   :  { %23 = dma.hbm_to_vmem [thread:$0]  %s16_s14, 384, %s18_s16, [#allocation4], %s476_s20, %s476_s20, %s477_s21  }
   0x6   :  { %s478_s22 = smov [#allocation6]   ;;  %s479_s24 = smov 64  }
   0x7   :  { %s30_s23 = sshll.u32 %s478_s22, 4  ;;  %s480_s0 = smov 4   ;;  %s31_s23 = int_to_ptr.vmem [resolvable:$true] %s30_s23 }
   0x8   :  { %36 = dma.hbm_to_vmem [thread:$0]  %s29_s19, 2048, %s31_s23, [#allocation7], %s479_s24, %s479_s24, %s480_s0  }
   0x9   :  { %469 = dma.done.wait [#allocation4], 384  }
   0xa   :  { %470 = vsyncadd [#allocation4], 4294966912 }
   0xb   :  { %471 = dma.done.wait [#allocation7], 2048  }
   0xc   :  { %472 = vsyncadd [#allocation7], 4294965248  ;;  %v364_v0 = vld [vmem:[#allocation6 + $0x38] sm:$0xff]  ;;  %v363_v2 = vld [vmem:[#allocation6 + $0x30] sm:$0xff]  ;;  %s481_s26 = smov [#allocation8]   ;;  %s269_s30 = sshll.u32 %s523_s3, 4  ;;  %s270_s30 = int_to_ptr.hbm [resolvable:$true] %s269_s30 }
   0xd   :  { %v372_v1 = vld [vmem:[#allocation6 + $0x78] sm:$0xff]  ;;  %205 = vmatpush.bf16.msra.mxu0 %v364_v0  ;;  %373 = vmatpush.bf16.msra.mxu2 %v364_v0  ;;  %v371_v3 = vld [vmem:[#allocation6 + $0x70] sm:$0xff]  ;;  %v362_v4 = vld [vmem:[#allocation6 + $0x28] sm:$0xff]  ;;  %s267_s27 = sshll.u32 %s481_s26, 4  ;;  %s268_s27 = int_to_ptr.vmem [resolvable:$true] %s267_s27 }
   0xe   :  { %223 = vmatpush.bf16.msra.mxu1 %v372_v1  ;;  %381 = vmatpush.bf16.msra.mxu3 %v372_v1  ;;  %v370_v5 = vld [vmem:[#allocation6 + $0x68] sm:$0xff]  ;;  %v361_v6 = vld [vmem:[#allocation6 + $0x20] sm:$0xff]  ;;  %v360_v8 = vld [vmem:[#allocation6 + $0x18] sm:$0xff] }
   0xf   :  { %v369_v7 = vld [vmem:[#allocation6 + $0x60] sm:$0xff]  ;;  %v368_v9 = vld [vmem:[#allocation6 + $0x58] sm:$0xff]  ;;  %v359_v10 = vld [vmem:[#allocation6 + $0x10] sm:$0xff] }
  0x10   :  { %v367_v11 = vld [vmem:[#allocation6 + $0x50] sm:$0xff]  ;;  %v358_v12 = vld [vmem:[#allocation6 + $0x8] sm:$0xff]  ;;  %v59_v13 = vld [vmem:[#allocation3 + $0x10] sm:$0xff] }
  0x11   :  { %206 = vmatpush.bf16.msra.mxu0 %v363_v2  ;;  %374 = vmatpush.bf16.msra.mxu2 %v363_v2  ;;  %v366_v14 = vld [vmem:[#allocation6 + $0x48] sm:$0xff]  ;;  %v99_v15 = vunpack.c.l.b16 %v59_v13  ;;  %v357_v16 = vld [vmem:[#allocation6] sm:$0xff]  ;;  %v356_v18 = vld [vmem:[#allocation3 + $0x4] sm:$0xf0]  ;;  %v100_v19 = vunpack.c.h.b16 %v59_v13 }
  0x12   :  { %224 = vmatpush.bf16.msra.mxu1 %v371_v3  ;;  %382 = vmatpush.bf16.msra.mxu3 %v371_v3  ;;  %v285_v17 = vld [vmem:[#allocation3] sm:$0xf]  ;;  %v365_v20 = vld [vmem:[#allocation6 + $0x40] sm:$0xff]  ;;  %v355_v21 = vld [vmem:[#allocation3 + $0x4] sm:$0xf] }
  0x13   :  { %v287_v22 = vld [vmem:[#allocation3 + $0x8] sm:$0xf0]  ;;  %v286_v23 = vor.u32 %v356_v18, %v285_v17  ;;  %v103_v24 = vpack.c.b16 %v99_v15, %v99_v15  ;;  %v104_v26 = vpack.c.b16 %v100_v19, %v100_v19  ;;  %v396_v28 = vld [vmem:[%s522_s2] ss:$0 sm:$0xff] }
  0x14   :  { %v290_v25 = vor.u32 %v355_v21, %v287_v22 }
  0x15   :  { %207 = vmatpush.bf16.msra.mxu0 %v362_v4  ;;  %375 = vmatpush.bf16.msra.mxu2 %v362_v4 }
  0x16   :  { %225 = vmatpush.bf16.msra.mxu1 %v370_v5  ;;  %383 = vmatpush.bf16.msra.mxu3 %v370_v5 }
  0x19   :  { %208 = vmatpush.bf16.msra.mxu0 %v361_v6  ;;  %376 = vmatpush.bf16.msra.mxu2 %v361_v6 }
  0x1a   :  { %226 = vmatpush.bf16.msra.mxu1 %v369_v7  ;;  %384 = vmatpush.bf16.msra.mxu3 %v369_v7 }
  0x1d   :  { %209 = vmatpush.bf16.msra.mxu0 %v360_v8  ;;  %377 = vmatpush.bf16.msra.mxu2 %v360_v8 }
  0x1e   :  { %227 = vmatpush.bf16.msra.mxu1 %v368_v9  ;;  %385 = vmatpush.bf16.msra.mxu3 %v368_v9 }
  0x21   :  { %210 = vmatpush.bf16.msra.mxu0 %v359_v10  ;;  %378 = vmatpush.bf16.msra.mxu2 %v359_v10 }
  0x22   :  { %228 = vmatpush.bf16.msra.mxu1 %v367_v11  ;;  %386 = vmatpush.bf16.msra.mxu3 %v367_v11 }
  0x25   :  { %211 = vmatpush.bf16.msra.mxu0 %v358_v12  ;;  %379 = vmatpush.bf16.msra.mxu2 %v358_v12 }
  0x26   :  { %229 = vmatpush.bf16.msra.mxu1 %v366_v14  ;;  %387 = vmatpush.bf16.msra.mxu3 %v366_v14 }
  0x29   :  { %212 = vmatpush.bf16.msra.mxu0 %v357_v16  ;;  %380 = vmatpush.bf16.msra.mxu2 %v357_v16 }
  0x2a   :  { %230 = vmatpush.bf16.msra.mxu1 %v365_v20  ;;  %388 = vmatpush.bf16.msra.mxu3 %v365_v20 }
  0x2c   :  { %213 = vmatmul.bf16.vlgmr.msra.gmra.mxu0 %v286_v23  ;;  %218 = vmatmul.bf16.vlgmr.msra.gmra.mxu2 %v103_v24 }
  0x2d   :  { %231 = vmatmul.bf16.vlgmr.msra.gmra.mxu1 %v290_v25  ;;  %236 = vmatmul.bf16.vlgmr.msra.gmra.mxu3 %v104_v26 }
  0xa9   :  { %v214_v27 = vpop.f32.mrf.mxu0 }
  0xaa   :  { %v232_v29 = vpop.f32.mrf.mxu1 }
  0xab   :  { %v233_v30 = vadd.f32 %v232_v29, %v214_v27 }
  0xad   :  { %v257_v31 = vadd.f32 %v396_v28, %v233_v30 }
  0xaf   :  { %260 = vst [vmem:[#allocation8] sm:$0xff] %v257_v31  ;;  %v219_v32 = vpop.f32.mrf.mxu2 }
  0xb0   :  { %v237_v33 = vpop.f32.mrf.mxu3 }
  0xb1   :  { %v238_v34 = vadd.f32 %v237_v33, %v219_v32  ;;  %v216_v35 = vpop.f32.mrf.mxu0 }
  0xb2   :  { %v234_v36 = vpop.f32.mrf.mxu1 }
  0xb3   :  { %v259_v37 = vadd.f32 %v396_v28, %v238_v34  ;;  %v235_v38 = vadd.f32 %v234_v36, %v216_v35 }
  0xb5   :  { %262 = vst [vmem:[#allocation8 + $0x10] sm:$0xff] %v259_v37  ;;  %v258_v39 = vadd.f32 %v396_v28, %v235_v38 }
  0xb7   :  { %261 = vst [vmem:[#allocation8 + $0x8] sm:$0xff] %v258_v39  ;;  %v221_v40 = vpop.f32.mrf.mxu2 }
  0xb8   :  { %v239_v41 = vpop.f32.mrf.mxu3  ;;  %275 = dma.vmem_to_hbm [thread:$0]  %s268_s27, 384, %s270_s30, [#allocation5], %s476_s20, %s476_s20, %s477_s21  }
  0xb9   :  { %473 = dma.done.wait [#allocation5], 384  }
  0xba   :  { %474 = vsyncadd [#allocation5], 4294966912 }
  0xbb   :  { %280 = vsyncpa [#allocation4], 1 }
  0xbc   :  { %281 = vsyncpa [#allocation7], 1 }
  0xbd   :  { %282 = vsyncpa [#allocation5], 1 }

</bundles_post_ra>
